<compile_context>
chip_gen: v7x
topology: tpu7x:2x2x1
jax: 0.10.0
libtpu: 0.0.40
codegen_flags: <defaults>
</compile_context>

<pallas_src>
import functools

import jax
import jax.numpy as jnp
from jax.experimental import pallas as pl
from jax.experimental.pallas import tpu as pltpu

SUB = 8        # sublane tile
LANE = 128     # lane tile
TILE_M = 512   # row tile for the batched (gridded) path


# --------------------------------------------------------------------------- #
# Kernel
# --------------------------------------------------------------------------- #
def agent_mlp_kernel(n_layers, use_bf16, x_ref, w0_ref, wrest_ref, b_ref, out_ref):
    """Fused MLP forward (whole network in one kernel invocation).

    x_ref     : (M, d0)          input rows, native width (no lane padding)
    w0_ref    : (d0, 128)        W_0.T zero-padded on N to 128 lanes
    wrest_ref : ((L-1)*128, 128) W_i.T (i>=1) each zero-padded to (128, 128)
    b_ref     : (L, 128)         row i = bias_i zero-padded to 128 lanes
    out_ref   : (M, d_out)       lane-thin output (no 16x writeback inflation)
    """
    d_out = out_ref.shape[-1]
    if use_bf16:
        cast = lambda a: a.astype(jnp.bfloat16)   # MXU is bf16-native
    else:
        cast = lambda a: a

    def layer(h, w, b):
        y = jnp.dot(cast(h), cast(w), preferred_element_type=jnp.float32) + b
        # ELU(alpha=1).  exp argument clamped to <= 0 so a large positive y
        # never produces inf on the (discarded) branch.
        return jnp.where(y > 0.0, y, jnp.exp(jnp.minimum(y, 0.0)) - 1.0)

    # Layer 0: contract K = d0 directly against the un-padded input block.
    h = layer(x_ref[...], w0_ref[...], b_ref[0:1, :])

    # Layers 1..L-1: full K = 128 contraction, no lane slicing of activations.
    # Padding lanes stay exactly zero through the chain (0@W=0, bias pad=0,
    # ELU(0)=0), so they contribute nothing.
    for i in range(1, n_layers):
        off = (i - 1) * LANE                       # 128-aligned static slice
        h = layer(h, wrest_ref[off:off + LANE, :], b_ref[i:i + 1, :])

    # Post-processing, per row:
    #   out[0] = min(out[0] + 1, 1) ; out[1] = min(out[1], 1)
    col = jax.lax.broadcasted_iota(jnp.int32, h.shape, 1)
    h = jnp.where(col == 0, h + 1.0, h)
    h = jnp.where(col <= 1, jnp.minimum(h, 1.0), h)

    # Lane-thin store: only the d_out real lanes ever reach HBM.
    out_ref[...] = h[:, :d_out]


# --------------------------------------------------------------------------- #
# One-time parameter preparation (hoisted out of the per-call hot path)
# --------------------------------------------------------------------------- #
def prepare_params(weights, biases):
    """weights[i]: (d_{i+1}, d_i), biases[i]: (d_{i+1},). Returns packed params."""
    n_layers = len(weights)
    assert n_layers >= 1
    d0 = int(weights[0].shape[1])
    d_out = int(weights[-1].shape[0])
    for w in weights:
        # TODO(synk): widths > 128 would need lane tiling; out of scope here.
        assert w.shape[0] <= LANE and w.shape[1] <= LANE

    # Layer 0: W_0.T, K kept native (= d0), N zero-padded to 128 lanes.
    w0 = jnp.zeros((d0, LANE), jnp.float32).at[:, :weights[0].shape[0]].set(
        jnp.asarray(weights[0], jnp.float32).T)

    # Layers 1..L-1: W_i.T zero-padded to full (128, 128), sublane-concatenated.
    if n_layers > 1:
        blocks = []
        for w in weights[1:]:
            do_i, di_i = w.shape
            blk = jnp.zeros((LANE, LANE), jnp.float32).at[:di_i, :do_i].set(
                jnp.asarray(w, jnp.float32).T)
            blocks.append(blk)
        w_rest = jnp.concatenate(blocks, axis=0)          # ((L-1)*128, 128)
    else:
        w_rest = jnp.zeros((SUB, LANE), jnp.float32)      # dummy (never read)

    b_all = jnp.zeros((n_layers, LANE), jnp.float32)
    for i, b in enumerate(biases):
        b_all = b_all.at[i, :b.shape[0]].set(jnp.asarray(b, jnp.float32))

    return w0, w_rest, b_all, n_layers, d_out


# --------------------------------------------------------------------------- #
# Forward
# --------------------------------------------------------------------------- #
@functools.partial(jax.jit, static_argnums=(4, 5, 6))
def _agent_forward_jit(xb, w0, w_rest, b_all, n_layers, d_out, use_bf16):
    bsz, d0 = xb.shape
    xb = xb.astype(jnp.float32)

    kernel = functools.partial(agent_mlp_kernel, n_layers, use_bf16)

    cost = pl.CostEstimate(
        flops=2 * bsz * (d0 * LANE + (n_layers - 1) * LANE * LANE),
        transcendentals=bsz * n_layers * LANE,
        bytes_accessed=(xb.size + w0.size + w_rest.size + b_all.size
                        + bsz * d_out) * 4,
    )

    if bsz <= TILE_M:
        # Latency path: grid-less, whole-array VMEM blocks, no pipeline
        # prologue/epilogue, no pad/slice HBM round-trips.
        return pl.pallas_call(
            kernel,
            out_shape=jax.ShapeDtypeStruct((bsz, d_out), jnp.float32),
            in_specs=[pl.BlockSpec(memory_space=pltpu.MemorySpace.VMEM)] * 4,
            out_specs=pl.BlockSpec(memory_space=pltpu.MemorySpace.VMEM),
            cost_estimate=cost,
        )(xb, w0, w_rest, b_all)

    # Throughput path: row grid; weights/biases stay VMEM-resident (constant
    # index_map); "parallel" lets v7x shard row tiles across both TensorCores.
    return pl.pallas_call(
        kernel,
        out_shape=jax.ShapeDtypeStruct((bsz, d_out), jnp.float32),
        grid=(pl.cdiv(bsz, TILE_M),),
        in_specs=[
            pl.BlockSpec((TILE_M, d0), lambda i: (i, 0)),
            pl.BlockSpec(w0.shape, lambda i: (0, 0)),
            pl.BlockSpec(w_rest.shape, lambda i: (0, 0)),
            pl.BlockSpec(b_all.shape, lambda i: (0, 0)),
        ],
        out_specs=pl.BlockSpec((TILE_M, d_out), lambda i: (i, 0)),
        compiler_params=pltpu.CompilerParams(
            dimension_semantics=("parallel",)),
        cost_estimate=cost,
    )(xb, w0, w_rest, b_all)


def agent_forward(x, params, use_bf16=False):
    """x: (d0,) single observation or (B, d0) batch. Returns (d_out,) or (B, d_out).

    If many agents are evaluated per environment step, batch their observations
    into ONE call (B = n_agents) — the kernel carries extra rows for free.
    """
    w0, w_rest, b_all, n_layers, d_out = params
    single = (x.ndim == 1)
    xb = x[None, :] if single else x
    out = _agent_forward_jit(xb, w0, w_rest, b_all, n_layers, d_out, use_bf16)
    return out[0] if single else out


# --------------------------------------------------------------------------- #
# Pure-JAX reference (mirrors the PyTorch module; batched over leading dim)
# --------------------------------------------------------------------------- #
def reference_forward(xb, weights, biases):
    h = jnp.asarray(xb, jnp.float32)
    for w, b in zip(weights, biases):
        y = h @ jnp.asarray(w, jnp.float32).T + jnp.asarray(b, jnp.float32)
        # ELU(alpha=1); exp(min(y,0))-1 == expm1(y) on the taken branch to <1e-7.
        h = jnp.where(y > 0, y, jnp.exp(jnp.minimum(y, 0.0)) - 1.0)
    h = h.at[..., 0].set(jnp.minimum(h[..., 0] + 1.0, 1.0))
    h = h.at[..., 1].set(jnp.minimum(h[..., 1], 1.0))
    return h


if __name__ == "__main__":
    # Shapes consistent with the module: dimensions = [16, 32, 32, 8]
    dimensions = [16, 32, 32, 8]

    key = jax.random.PRNGKey(0)
    key, xk = jax.random.split(key)
    x = jax.random.normal(xk, (dimensions[0],), dtype=jnp.float32)

    weights, biases = [], []
    for i in range(len(dimensions) - 1):
        key, wk, bk = jax.random.split(key, 3)
        weights.append(jax.random.uniform(
            wk, (dimensions[i + 1], dimensions[i]), jnp.float32,
            minval=-2.0, maxval=2.0))
        biases.append(jax.random.uniform(
            bk, (dimensions[i + 1],), jnp.float32, minval=-2.0, maxval=2.0))

    params = prepare_params(weights, biases)

    # 1) Single-observation forward (the module's call pattern).
    out = jax.block_until_ready(agent_forward(x, params))
    ref = reference_forward(x[None, :], weights, biases)[0]
    assert out.shape == (dimensions[-1],)
    assert jnp.allclose(out, ref, atol=1e-5, rtol=1e-5), (out, ref)

    # 2) Small batch (grid-less latency path).
    key, xbk = jax.random.split(key)
    xb = jax.random.normal(xbk, (8, dimensions[0]), dtype=jnp.float32)
    outb = jax.block_until_ready(agent_forward(xb, params))
    refb = reference_forward(xb, weights, biases)
    assert outb.shape == (8, dimensions[-1])
    assert jnp.allclose(outb, refb, atol=1e-5, rtol=1e-5), (outb, refb)

    # 3) Batch > TILE_M: gridded path (partial last row tile, "parallel" axis
    #    so both v7x TensorCores are used; weights stay VMEM-resident).
    key, xlk = jax.random.split(key)
    xl = jax.random.normal(xlk, (600, dimensions[0]), dtype=jnp.float32)
    outl = jax.block_until_ready(agent_forward(xl, params))
    refl = reference_forward(xl, weights, biases)
    assert outl.shape == (600, dimensions[-1])
    assert jnp.allclose(outl, refl, atol=1e-4, rtol=1e-5), (outl, refl)

    # 4) Optional bf16-operand throughput mode (f32 accumulation): exercised
    #    for compile/runtime health; numerics are intentionally looser, so we
    #    only sanity-check shape and finiteness here.
    outbf = jax.block_until_ready(agent_forward(xl, params, use_bf16=True))
    assert outbf.shape == (600, dimensions[-1])
    assert bool(jnp.all(jnp.isfinite(outbf)))

    print("KERNEL_OK")
</pallas_src>

<mosaic_0001>
module attributes {stable_mosaic.version = 11 : i64} {
  func.func @agent_mlp_kernel(%arg0: memref<1x16xf32, #tpu.memory_space<vmem>>, %arg1: memref<16x128xf32, #tpu.memory_space<vmem>>, %arg2: memref<256x128xf32, #tpu.memory_space<vmem>>, %arg3: memref<3x128xf32, #tpu.memory_space<vmem>>, %arg4: memref<1x8xf32, #tpu.memory_space<vmem>>) attributes {dimension_semantics = [], scalar_prefetch = 0 : i64, scratch_operands = 0 : i64, tpu.core_type = #tpu.core_type<tc>} {
    %c0 = arith.constant 0 : index
    %c0_0 = arith.constant 0 : index
    %0 = vector.load %arg0[%c0, %c0_0] : memref<1x16xf32, #tpu.memory_space<vmem>>, vector<1x16xf32>
    %c0_1 = arith.constant 0 : index
    %c0_2 = arith.constant 0 : index
    %1 = vector.load %arg1[%c0_1, %c0_2] : memref<16x128xf32, #tpu.memory_space<vmem>>, vector<16x128xf32>
    %c0_3 = arith.constant 0 : index
    %c0_4 = arith.constant 0 : index
    %2 = vector.load %arg3[%c0_3, %c0_4] : memref<3x128xf32, #tpu.memory_space<vmem>>, vector<1x128xf32>
    %cst = arith.constant dense<0.000000e+00> : vector<1x128xf32>
    %3 = tpu.matmul %0, %1, %cst {dimension_numbers = #tpu.dot_dimension_numbers<[1], [0], [0], [1], [0, 0, 1, 1], [], []>} : vector<1x16xf32>, vector<16x128xf32>, vector<1x128xf32> -> vector<1x128xf32>
    %4 = arith.addf %3, %2 : vector<1x128xf32>
    %cst_5 = arith.constant 0.000000e+00 : f32
    %5 = vector.broadcast %cst_5 : f32 to vector<1x128xf32>
    %6 = arith.cmpf ogt, %4, %5 : vector<1x128xf32>
    %cst_6 = arith.constant 0.000000e+00 : f32
    %7 = vector.broadcast %cst_6 : f32 to vector<1x128xf32>
    %8 = arith.minimumf %4, %7 : vector<1x128xf32>
    %9 = math.exp %8 : vector<1x128xf32>
    %cst_7 = arith.constant 1.000000e+00 : f32
    %10 = vector.broadcast %cst_7 : f32 to vector<1x128xf32>
    %11 = arith.subf %9, %10 : vector<1x128xf32>
    %12 = arith.select %6, %4, %11 : vector<1x128xi1>, vector<1x128xf32>
    %c0_8 = arith.constant 0 : index
    %c0_9 = arith.constant 0 : index
    %13 = vector.load %arg2[%c0_8, %c0_9] : memref<256x128xf32, #tpu.memory_space<vmem>>, vector<128x128xf32>
    %c1 = arith.constant 1 : index
    %c0_10 = arith.constant 0 : index
    %14 = vector.load %arg3[%c1, %c0_10] : memref<3x128xf32, #tpu.memory_space<vmem>>, vector<1x128xf32>
    %cst_11 = arith.constant dense<0.000000e+00> : vector<1x128xf32>
    %15 = tpu.matmul %12, %13, %cst_11 {dimension_numbers = #tpu.dot_dimension_numbers<[1], [0], [0], [1], [0, 0, 1, 1], [], []>} : vector<1x128xf32>, vector<128x128xf32>, vector<1x128xf32> -> vector<1x128xf32>
    %16 = arith.addf %15, %14 : vector<1x128xf32>
    %cst_12 = arith.constant 0.000000e+00 : f32
    %17 = vector.broadcast %cst_12 : f32 to vector<1x128xf32>
    %18 = arith.cmpf ogt, %16, %17 : vector<1x128xf32>
    %cst_13 = arith.constant 0.000000e+00 : f32
    %19 = vector.broadcast %cst_13 : f32 to vector<1x128xf32>
    %20 = arith.minimumf %16, %19 : vector<1x128xf32>
    %21 = math.exp %20 : vector<1x128xf32>
    %cst_14 = arith.constant 1.000000e+00 : f32
    %22 = vector.broadcast %cst_14 : f32 to vector<1x128xf32>
    %23 = arith.subf %21, %22 : vector<1x128xf32>
    %24 = arith.select %18, %16, %23 : vector<1x128xi1>, vector<1x128xf32>
    %c128 = arith.constant 128 : index
    %c0_15 = arith.constant 0 : index
    %25 = vector.load %arg2[%c128, %c0_15] : memref<256x128xf32, #tpu.memory_space<vmem>>, vector<128x128xf32>
    %c2 = arith.constant 2 : index
    %c0_16 = arith.constant 0 : index
    %26 = vector.load %arg3[%c2, %c0_16] : memref<3x128xf32, #tpu.memory_space<vmem>>, vector<1x128xf32>
    %cst_17 = arith.constant dense<0.000000e+00> : vector<1x128xf32>
    %27 = tpu.matmul %24, %25, %cst_17 {dimension_numbers = #tpu.dot_dimension_numbers<[1], [0], [0], [1], [0, 0, 1, 1], [], []>} : vector<1x128xf32>, vector<128x128xf32>, vector<1x128xf32> -> vector<1x128xf32>
    %28 = arith.addf %27, %26 : vector<1x128xf32>
    %cst_18 = arith.constant 0.000000e+00 : f32
    %29 = vector.broadcast %cst_18 : f32 to vector<1x128xf32>
    %30 = arith.cmpf ogt, %28, %29 : vector<1x128xf32>
    %cst_19 = arith.constant 0.000000e+00 : f32
    %31 = vector.broadcast %cst_19 : f32 to vector<1x128xf32>
    %32 = arith.minimumf %28, %31 : vector<1x128xf32>
    %33 = math.exp %32 : vector<1x128xf32>
    %cst_20 = arith.constant 1.000000e+00 : f32
    %34 = vector.broadcast %cst_20 : f32 to vector<1x128xf32>
    %35 = arith.subf %33, %34 : vector<1x128xf32>
    %36 = arith.select %30, %28, %35 : vector<1x128xi1>, vector<1x128xf32>
    %37 = tpu.iota {dimensions = array<i32: 1>} : vector<1x128xi32>
    %c0_i32 = arith.constant 0 : i32
    %38 = vector.broadcast %c0_i32 : i32 to vector<1x128xi32>
    %39 = arith.cmpi eq, %37, %38 : vector<1x128xi32>
    %cst_21 = arith.constant 1.000000e+00 : f32
    %40 = vector.broadcast %cst_21 : f32 to vector<1x128xf32>
    %41 = arith.addf %36, %40 : vector<1x128xf32>
    %42 = arith.select %39, %41, %36 : vector<1x128xi1>, vector<1x128xf32>
    %c1_i32 = arith.constant 1 : i32
    %43 = vector.broadcast %c1_i32 : i32 to vector<1x128xi32>
    %44 = arith.cmpi sle, %37, %43 : vector<1x128xi32>
    %cst_22 = arith.constant 1.000000e+00 : f32
    %45 = vector.broadcast %cst_22 : f32 to vector<1x128xf32>
    %46 = arith.minimumf %42, %45 : vector<1x128xf32>
    %47 = arith.select %44, %46, %42 : vector<1x128xi1>, vector<1x128xf32>
    %48 = vector.extract_strided_slice %47 {offsets = [0, 0], sizes = [1, 8], strides = [1, 1]} : vector<1x128xf32> to vector<1x8xf32>
    %c0_23 = arith.constant 0 : index
    %c0_24 = arith.constant 0 : index
    %49 = vector.load %arg4[%c0_23, %c0_24] : memref<1x8xf32, #tpu.memory_space<vmem>>, vector<1x8xf32>
    tpu.vector_store %arg4[%c0_23, %c0_24], %48 {strides = array<i32>} : memref<1x8xf32, #tpu.memory_space<vmem>>, vector<1x8xf32>,
    return
  }
}

</mosaic_0001>

<bundles_post_ra>
// kernel: _agent_forward_jit.1
= control target key start
LH: loop header
LB: loop body
LE: loop exit
PB: predicated region body
PF: predicated region fallthrough
CT: control target
= control target key end

     0   :  { %9 = vsyncpa [#allocation3], 0  ;;  %s748_s0 = inlined_call_operand.hbm [shape: f32[1,16], index: 0, kind: input, shape index: {}]   ;;  %s749_s1 = inlined_call_operand.hbm [shape: f32[16,128], index: 1, kind: input, shape index: {}]   ;;  %s750_s2 = inlined_call_operand.hbm [shape: f32[256,128], index: 2, kind: input, shape index: {}]   ;;  %s751_s3 = inlined_call_operand.vmem [shape: f32[3,128], index: 3, kind: input, shape index: {}]   ;;  %s752_s4 = inlined_call_operand.hbm [shape: f32[1,8], index: 4, kind: output, shape index: {}]  }
   0x1   :  { %10 = vsyncpa [#allocation6], 0 }
   0x2   :  { %11 = vsyncpa [#allocation4], 0  ;;  %s631_s15 = smov [#allocation5]   ;;  %s537_s19 = scalar_lea.hbm %s749_s1, 256 }
   0x3   :  { %s27_s16 = sshll.u32 %s631_s15, 4  ;;  %p538_p0 = scmp.ne.s32.totalorder %s749_s1, %s537_s19  ;;  %s28_s16 = int_to_ptr.vmem [resolvable:$true] %s27_s16 }
   0x4   :  { %p541_p1 = scmp.lt.u32.totalorder %s537_s19, %s749_s1 }
   0x6   :  { %p543_p2 = pnand %p541_p1, %p538_p0 }
   0x8   :  { %546 = shalt.err (!%p543_p2)
}
   0x9   :  { %s547_s24 = scalar_lea.vmem %s28_s16, 256  ;;  %p552_p4 = scmp.lt.s32.totalorder %s28_s16, %s28_s16 }
   0xa   :  { %p548_p3 = scmp.ne.s32.totalorder %s28_s16, %s547_s24  ;;  %p553_p5 = scmp.lt.s32.totalorder %s547_s24, %s547_s24 }
   0xc   :  { %p554_p6 = por %p553_p5, %p552_p4 }
   0xe   :  { %p555_p7 = pnand %p554_p6, %p548_p3 }
  0x10   :  { %558 = shalt.err (!%p555_p7)
}
  0x11   :  { %s632_s25 = smov 128   ;;  %s633_s26 = smov 8  }
  0x12   :  { %33 = dma.hbm_to_vmem [thread:$0]  %s749_s1, 256, %s28_s16, [#allocation6], %s632_s25, %s632_s25, %s633_s26  }
  0x13   :  { %s634_s29 = smov [#allocation2]   ;;  %s635_s5 = smov [#allocation7]  }
  0x14   :  { %s18_s30 = sshll.u32 %s634_s29, 4  ;;  %s39_s6 = sshll.u32 %s635_s5, 4  ;;  %s19_s30 = int_to_ptr.vmem [resolvable:$true] %s18_s30  ;;  %s40_s6 = int_to_ptr.vmem [resolvable:$true] %s39_s6 }
  0x15   :  { %s559_s9 = scalar_lea.hbm %s748_s0, 16 }
  0x16   :  { %p560_p8 = scmp.ne.s32.totalorder %s748_s0, %s559_s9  ;;  %p563_p9 = scmp.lt.u32.totalorder %s559_s9, %s748_s0 }
  0x18   :  { %p565_p10 = pnand %p563_p9, %p560_p8 }
  0x1a   :  { %568 = shalt.err (!%p565_p10)
}
  0x1b   :  { %s569_s1 = scalar_lea.vmem %s19_s30, 16  ;;  %s573_s14 = scalar_lea.vmem %s19_s30, 32 }
  0x1c   :  { %p570_p11 = scmp.ne.s32.totalorder %s19_s30, %s569_s1  ;;  %p574_p12 = scmp.lt.s32.totalorder %s19_s30, %s19_s30 }
  0x1d   :  { %p575_p13 = scmp.lt.s32.totalorder %s573_s14, %s569_s1 }
  0x1f   :  { %p576_p0 = por %p575_p13, %p574_p12 }
  0x21   :  { %p577_p1 = pnand %p576_p0, %p570_p11 }
  0x23   :  { %580 = shalt.err (!%p577_p1)
}
  0x24   :  { %21 = dma.hbm_to_vmem [thread:$0]  %s748_s0, 16, %s19_s30, [#allocation3]  }
  0x25   :  { %s581_s19 = scalar_lea.hbm %s750_s2, 4096 }
  0x26   :  { %p582_p2 = scmp.ne.s32.totalorder %s750_s2, %s581_s19  ;;  %p585_p3 = scmp.lt.u32.totalorder %s581_s19, %s750_s2 }
  0x28   :  { %p587_p4 = pnand %p585_p3, %p582_p2 }
  0x2a   :  { %590 = shalt.err (!%p587_p4)
}
  0x2b   :  { %s591_s24 = scalar_lea.vmem %s40_s6, 4096  ;;  %p596_p6 = scmp.lt.s32.totalorder %s40_s6, %s40_s6 }
  0x2c   :  { %p592_p5 = scmp.ne.s32.totalorder %s40_s6, %s591_s24  ;;  %p597_p7 = scmp.lt.s32.totalorder %s591_s24, %s591_s24 }
  0x2e   :  { %p598_p8 = por %p597_p7, %p596_p6 }
  0x30   :  { %p599_p9 = pnand %p598_p8, %p592_p5 }
  0x32   :  { %602 = shalt.err (!%p599_p9)
}
  0x33   :  { %45 = dma.hbm_to_vmem [thread:$0]  %s750_s2, 4096, %s40_s6, [#allocation6], %s632_s25, %s632_s25, %s633_s26  }
  0x34   :  { %625 = dma.done.wait [#allocation3], 16  }
  0x35   :  { %626 = vsyncadd [#allocation3], 4294967280 }
  0x36   :  { %627 = dma.done.wait [#allocation6], 4352  }
  0x37   :  { %628 = vsyncadd [#allocation6], 4294962944  ;;  %v636_v0 = vmov 0.0|0.0   ;;  %vm637_vm0 = vmmov 0   ;;  %v638_v1 = vmov 0.0   ;;  %v58_v2 = vld [vmem:[#allocation5] sm:$0xff] }
  0x38   :  { %471 = vmatprep.subr.bf16.mxu0 %v636_v0  ;;  %398 = vmatprep.mubr.msk.f32.mxu0 %vm637_vm0, %v638_v1  ;;  %v59_v3 = vld [vmem:[#allocation5 + $0x8] sm:$0xff]  ;;  %v141_v5 = vld [vmem:[#allocation7] sm:$0xff]  ;;  %v142_v6 = vld [vmem:[#allocation7 + $0x8] sm:$0xff]  ;;  %vm61_vm1 = vcmask 130048   ;;  %s639_s5 = smov [#allocation8]   ;;  %vm335_vm7 = vcmask 57344  }
  0x39   :  { %474 = vmatprep.subr.bf16.mxu1 %v636_v0  ;;  %433 = vmatprep.mubr.msk.f32.mxu1 %vm637_vm0, %v638_v1  ;;  %v472_v4 = vpack.c.bf16 %v59_v3, %v58_v2  ;;  %v143_v7 = vld [vmem:[#allocation7 + $0x10] sm:$0xff]  ;;  %v475_v8 = vpack.c.bf16 %v142_v6, %v141_v5  ;;  %v144_v9 = vld [vmem:[#allocation7 + $0x18] sm:$0xff]  ;;  %v57_v10 = vld [vmem:[#allocation2] sm:$0x1]  ;;  %s343_s6 = sshll.u32 %s639_s5, 4  ;;  %s344_s6 = int_to_ptr.vmem [resolvable:$true] %s343_s6 }
  0x3a   :  { %v478_v11 = vpack.c.bf16 %v144_v9, %v143_v7  ;;  %v145_v12 = vld [vmem:[#allocation7 + $0x20] sm:$0xff]  ;;  %v146_v13 = vld [vmem:[#allocation7 + $0x28] sm:$0xff]  ;;  %v147_v15 = vld [vmem:[#allocation7 + $0x30] sm:$0xff]  ;;  %s607_s7 = scalar_lea.vmem %s344_s6, 32  ;;  %p608_p11 = scmp.lt.s32.totalorder %s344_s6, %s344_s6 }
  0x3b   :  { %473 = vmatpush3.bf16.msra.mxu0 %v472_v4  ;;  %476 = vmatpush3.bf16.msra.mxu1 %v475_v8  ;;  %v481_v14 = vpack.c.bf16 %v146_v13, %v145_v12  ;;  %v148_v16 = vld [vmem:[#allocation7 + $0x38] sm:$0xff]  ;;  %v149_v18 = vld [vmem:[#allocation7 + $0x40] sm:$0xff]  ;;  %v150_v19 = vld [vmem:[#allocation7 + $0x48] sm:$0xff] }
  0x3c   :  { %498 = vmatprep.subr.bf16.mxu0 %v636_v0  ;;  %477 = vmatprep.subr.bf16.mxu1 %v636_v0  ;;  %v484_v17 = vpack.c.bf16 %v148_v16, %v147_v15  ;;  %v487_v20 = vpack.c.bf16 %v150_v19, %v149_v18  ;;  %v151_v21 = vld [vmem:[#allocation7 + $0x50] sm:$0xff]  ;;  %v152_v22 = vld [vmem:[#allocation7 + $0x58] sm:$0xff]  ;;  %v153_v23 = vld [vmem:[#allocation7 + $0x60] sm:$0xff] }
  0x3d   :  { %v490_v24 = vpack.c.bf16 %v152_v22, %v151_v21  ;;  %v154_v25 = vld [vmem:[#allocation7 + $0x68] sm:$0xff]  ;;  %v155_v27 = vld [vmem:[#allocation7 + $0x70] sm:$0xff]  ;;  %v156_v28 = vld [vmem:[#allocation7 + $0x78] sm:$0xff] }
  0x3e   :  { %399 = vmatmul.mubr.msk.f32.vlgmr.msra.gmra.mrb[0].mxu0 %vm61_vm1, %v57_v10  ;;  %v493_v26 = vpack.c.bf16 %v154_v25, %v153_v23  ;;  %v496_v29 = vpack.c.bf16 %v156_v28, %v155_v27  ;;  %v234_v30 = vld [vmem:[#allocation7 + $0x80] sm:$0xff]  ;;  %v235_v31 = vld [vmem:[#allocation7 + $0x88] sm:$0xff]  ;;  %v236_v32 = vld [vmem:[#allocation7 + $0x90] sm:$0xff] }
  0x3f   :  { %468 = vmatprep.mubr.msk.f32.mxu0 %vm637_vm0, %v638_v1  ;;  %479 = vmatpush3.bf16.msra.mxu1 %v478_v11  ;;  %v499_v33 = vpack.c.bf16 %v235_v31, %v234_v30  ;;  %v237_v34 = vld [vmem:[#allocation7 + $0x98] sm:$0xff]  ;;  %v238_v36 = vld [vmem:[#allocation7 + $0xa0] sm:$0xff]  ;;  %v239_v37 = vld [vmem:[#allocation7 + $0xa8] sm:$0xff] }
  0x40   :  { %480 = vmatprep.subr.bf16.mxu1 %v636_v0  ;;  %v502_v35 = vpack.c.bf16 %v237_v34, %v236_v32  ;;  %v505_v38 = vpack.c.bf16 %v239_v37, %v238_v36  ;;  %v60_v39 = vld [vmem:[%s751_s3] sm:$0x1]  ;;  %v240_v48 = vld [vmem:[#allocation7 + $0xb0] sm:$0xff]  ;;  %v241_v49 = vld [vmem:[#allocation7 + $0xb8] sm:$0xff] }
  0x41   :  { %500 = vmatpush3.bf16.msra.mxu0 %v499_v33  ;;  %v508_v50 = vpack.c.bf16 %v241_v49, %v240_v48  ;;  %v242_v51 = vld [vmem:[#allocation7 + $0xc0] sm:$0xff]  ;;  %v243_v52 = vld [vmem:[#allocation7 + $0xc8] sm:$0xff]  ;;  %v244_v54 = vld [vmem:[#allocation7 + $0xd0] sm:$0xff] }
  0x42   :  { %501 = vmatprep.subr.bf16.mxu0 %v636_v0  ;;  %v511_v53 = vpack.c.bf16 %v243_v52, %v242_v51  ;;  %v245_v55 = vld [vmem:[#allocation7 + $0xd8] sm:$0xff]  ;;  %v246_v56 = vld [vmem:[#allocation7 + $0xe0] sm:$0xff]  ;;  %v247_v58 = vld [vmem:[#allocation7 + $0xe8] sm:$0xff] }
  0x43   :  { %482 = vmatpush3.bf16.msra.mxu1 %v481_v14  ;;  %v514_v57 = vpack.c.bf16 %v245_v55, %v244_v54  ;;  %v517_v59 = vpack.c.bf16 %v247_v58, %v246_v56  ;;  %v248_v60 = vld [vmem:[#allocation7 + $0xf0] sm:$0xff]  ;;  %v249_v61 = vld [vmem:[#allocation7 + $0xf8] sm:$0xff]  ;;  %v157_v63 = vld [vmem:[%s751_s3 + $0x1] sm:$0x1]  ;;  %v327_v14 = vlaneseq }
  0x44   :  { %483 = vmatprep.subr.bf16.mxu1 %v636_v0  ;;  %v520_v62 = vpack.c.bf16 %v249_v61, %v248_v60 }
  0x45   :  { %503 = vmatpush3.bf16.msra.mxu0 %v502_v35  ;;  %v328_v15 = vand.u32 127, %v327_v14 }
  0x46   :  { %504 = vmatprep.subr.bf16.mxu0 %v636_v0 }
  0x47   :  { %485 = vmatpush3.bf16.msra.mxu1 %v484_v17  ;;  %vm329_vm5 = vcmp.eq.s32.totalorder %v328_v15, 0  ;;  %vm332_vm6 = vcmp.le.s32.totalorder %v328_v15, 1 }
  0x48   :  { %486 = vmatprep.subr.bf16.mxu1 %v636_v0 }
  0x49   :  { %506 = vmatpush3.bf16.msra.mxu0 %v505_v38 }
  0x4a   :  { %507 = vmatprep.subr.bf16.mxu0 %v636_v0 }
  0x4b   :  { %488 = vmatpush3.bf16.msra.mxu1 %v487_v20 }
  0x4c   :  { %489 = vmatprep.subr.bf16.mxu1 %v636_v0 }
  0x4d   :  { %509 = vmatpush3.bf16.msra.mxu0 %v508_v50 }
  0x4e   :  { %510 = vmatprep.subr.bf16.mxu0 %v636_v0 }
  0x4f   :  { %491 = vmatpush3.bf16.msra.mxu1 %v490_v24 }
  0x50   :  { %492 = vmatprep.subr.bf16.mxu1 %v636_v0 }
  0x51   :  { %512 = vmatpush3.bf16.msra.mxu0 %v511_v53 }
  0x52   :  { %513 = vmatprep.subr.bf16.mxu0 %v636_v0 }
  0x53   :  { %494 = vmatpush3.bf16.msra.mxu1 %v493_v26 }
  0x54   :  { %495 = vmatprep.subr.bf16.mxu1 %v636_v0 }
  0x55   :  { %515 = vmatpush3.bf16.msra.mxu0 %v514_v57 }
  0x56   :  { %516 = vmatprep.subr.bf16.mxu0 %v636_v0 }
  0x57   :  { %497 = vmatpush3.bf16.msra.mxu1 %v496_v29 }
  0x59   :  { %518 = vmatpush3.bf16.msra.mxu0 %v517_v59 }
  0x5a   :  { %519 = vmatprep.subr.bf16.mxu0 %v636_v0  ;;  %v250_v0 = vld [vmem:[%s751_s3 + $0x2] sm:$0x1]  ;;  %s603_s3 = scalar_lea.vmem %s344_s6, 16 }
  0x5b   :  { %p604_p10 = scmp.ne.s32.totalorder %s344_s6, %s603_s3  ;;  %p609_p12 = scmp.lt.s32.totalorder %s607_s7, %s603_s3 }
  0x5d   :  { %521 = vmatpush3.bf16.msra.mxu0 %v520_v62  ;;  %p610_p13 = por %p609_p12, %p608_p11 }
  0x5f   :  { %p611_p0 = pnand %p610_p13, %p604_p10 }
 0x111   :  { %v131_v40 = vpop.f32.mrb[0].mxu0 }
 0x112   :  { %v132_v41 = vadd.f32 %v131_v40, %v60_v39  ;;  %v400_v42 = vpop.f32.mrb[1].mxu0 }
 0x114   :  { %v136_v43 = vmin.f32 %v132_v41, 0.0  ;;  %vm135_vm2 = vcmp.gt.f32.partialorder %v132_v41, 0.0 }
 0x116   :  { %v137_v44 = vmul.f32 1.442695, %v136_v43 }
 0x118   :  { %531 = vpow2.f32 %v137_v44 }
 0x122   :  { %v532_v45 = vpop.eup %531 }
 0x123   :  { %v354_v46 = vadd.f32 -1.0, %v532_v45 }
 0x125   :  { %v140_v47 = vsel %vm135_vm2, %v132_v41, %v354_v46 }
 0x126   :  { %434 = vmatmul.mubr.f32.vlgmr.msra.gmra.mrb[0].mxu1 %v140_v47 }
 0x1f9   :  { %v224_v1 = vpop.f32.mrb[0].mxu1 }
 0x1fa   :  { %v225_v2 = vadd.f32 %v224_v1, %v157_v63  ;;  %v435_v3 = vpop.f32.mrb[1].mxu1 }
 0x1fc   :  { %v229_v4 = vmin.f32 %v225_v2, 0.0  ;;  %vm228_vm3 = vcmp.gt.f32.partialorder %v225_v2, 0.0 }
 0x1fe   :  { %v230_v5 = vmul.f32 1.442695, %v229_v4 }
 0x200   :  { %533 = vpow2.f32 %v230_v5 }
 0x20a   :  { %v534_v6 = vpop.eup %533 }
 0x20b   :  { %v355_v7 = vadd.f32 -1.0, %v534_v6 }
 0x20d   :  { %v233_v8 = vsel %vm228_vm3, %v225_v2, %v355_v7 }
 0x20e   :  { %469 = vmatmul.mubr.f32.vlgmr.msra.gmra.mrb[2].mxu0 %v233_v8 }
 0x2e1   :  { %v317_v9 = vpop.f32.mrb[2].mxu0 }
 0x2e2   :  { %v318_v10 = vadd.f32 %v317_v9, %v250_v0  ;;  %v470_v11 = vpop.f32.mrb[3].mxu0 }
 0x2e4   :  { %v322_v12 = vmin.f32 %v318_v10, 0.0  ;;  %vm321_vm4 = vcmp.gt.f32.partialorder %v318_v10, 0.0 }
 0x2e6   :  { %v323_v13 = vmul.f32 1.442695, %v322_v12 }
 0x2e8   :  { %535 = vpow2.f32 %v323_v13 }
 0x2f2   :  { %v536_v16 = vpop.eup %535 }
 0x2f3   :  { %v356_v17 = vadd.f32 -1.0, %v536_v16 }
 0x2f5   :  { %v326_v18 = vsel %vm321_vm4, %v318_v10, %v356_v17 }
 0x2f6   :  { %v330_v19 = vadd.f32 1.0, %v326_v18 }
 0x2f8   :  { %v331_v20 = vsel %vm329_vm5, %v330_v19, %v326_v18 }
 0x2f9   :  { %v333_v21 = vmin.f32 %v331_v20, 1.0 }
 0x2fb   :  { %v334_v22 = vsel %vm332_vm6, %v333_v21, %v331_v20 }
 0x2fc   :  { %336 = vst.msk [vmem:[#allocation8] sm:$0x1] %vm335_vm7, %v334_v22 }
 0x2fd   :  { %614 = shalt.err (!%p611_p0)
}
 0x2fe   :  { %s615_s10 = scalar_lea.hbm %s752_s4, 16 }
 0x2ff   :  { %p616_p1 = scmp.ne.s32.totalorder %s752_s4, %s615_s10  ;;  %p619_p2 = scmp.lt.u32.totalorder %s615_s10, %s752_s4 }
 0x301   :  { %p621_p3 = pnand %p619_p2, %p616_p1 }
 0x303   :  { %624 = shalt.err (!%p621_p3)
}
 0x304   :  { %346 = dma.vmem_to_hbm [thread:$0]  %s344_s6, 16, %s752_s4, [#allocation4]  }
 0x305   :  { %629 = dma.done.wait [#allocation4], 16  }
 0x306   :  { %630 = vsyncadd [#allocation4], 4294967280 }
 0x307   :  { %350 = vsyncpa [#allocation3], 1 }
 0x308   :  { %351 = vsyncpa [#allocation6], 1 }
 0x309   :  { %352 = vsyncpa [#allocation4], 1 }

</bundles_post_ra>
